<compile_context>
chip_gen: v5e
topology: v5e:2x2
jax: 0.10.0
libtpu: 0.0.40
codegen_flags: <defaults>
</compile_context>

<pallas_src>
import functools

import jax
import jax.numpy as jnp
from jax.experimental import pallas as pl
from jax.experimental.pallas import tpu as pltpu


def _round_up(x, m):
    return (x + m - 1) // m * m


def _sublane(itemsize):
    # fp32 -> 8, bf16 -> 16, int8/fp8 -> 32
    return {4: 8, 2: 16, 1: 32}.get(itemsize, 8)


def _self_attention_kernel(chunk_b, h_ref, w1_ref, b1_ref, w2_ref, o_ref):
    BB, T, D = h_ref.shape
    S = w1_ref.shape[1]
    n_chunks = BB // chunk_b

    # Small resident parameters: load once per grid step, outside the loop.
    w1 = w1_ref[...]            # (D, S)
    b1 = b1_ref[...]            # (1, S)
    w2 = w2_ref[...]            # (1, S)  (Regress2 weight as a row)

    # Inner loop over CB-sequence chunks: BB only sets the DMA granule; the
    # compute working set per iteration stays at a few dozen vregs.
    @pl.loop(0, n_chunks)
    def _(c):
        r0 = pl.multiple_of(c * chunk_b, chunk_b)
        hc = h_ref[pl.ds(r0, chunk_b), :, :]                       # (CB, T, D)

        # Regress1 + tanh: one (CB*T, D) @ (D, S) MXU matmul, fp32 accumulate.
        s = jnp.tanh(
            jnp.dot(hc.reshape(chunk_b * T, D), w1,
                    preferred_element_type=jnp.float32) + b1)      # (CB*T, S)

        # Regress2 as VPU multiply + lane reduction -> lane-dense (CB, T)
        # logits.  b2 is dropped: softmax(x + c) == softmax(x).
        logits = jnp.sum(s.reshape(chunk_b, T, S) * w2, axis=-1)   # (CB, T)

        # Softmax over time on the lane-dense layout (exact reciprocal:
        # the kernel is HBM-bound, so this costs nothing and keeps parity).
        m = jnp.max(logits, axis=-1, keepdims=True)
        e = jnp.exp(logits - m)
        alpha = e / jnp.sum(e, axis=-1, keepdims=True)             # (CB, T)

        # Weighted average over time: VPU broadcast-mul + sublane reduce,
        # fp32 accumulation via dtype promotion (alpha is fp32).
        out = jnp.sum(alpha[:, :, None] * hc, axis=1)              # (CB, D)
        o_ref[pl.ds(r0, chunk_b), :] = out.astype(o_ref.dtype)


def self_attention(h, w1, b1, w2, b2=None, *, block_b=None, interpret=False):
    """Pallas forward pass of SelfAttention.

    `b2` is accepted for API parity but mathematically unused (softmax shift
    invariance).  `h` may be fp32 or bf16; compute accumulates in fp32.
    """
    del b2
    B, T, D = h.shape
    S = w1.shape[1]
    itemsize = h.dtype.itemsize
    sub = _sublane(itemsize)

    # Lane/sublane-padded sizes (what the block actually occupies in VMEM).
    D_pad = _round_up(D, 128)
    T_pad = _round_up(T, sub)
    seq_hbm_bytes = max(1, T * D * itemsize)
    seq_vmem_bytes = max(1, T_pad * D_pad * itemsize)

    # ---- batch block (DMA granule) --------------------------------------
    if block_b is None:
        # ~6 MiB of HBM traffic per block, clamped so the two in-flight
        # (double-buffered) lane-padded h buffers stay around <= 24 MiB VMEM.
        block_b = min((6 << 20) // seq_hbm_bytes, (12 << 20) // seq_vmem_bytes)
    block_b = max(sub, int(block_b))
    # Keep >= ~4 grid steps when the batch allows it so v7x's two TensorCores
    # both get work and the DMA/compute pipeline has something to overlap.
    if B >= 4 * sub:
        block_b = min(block_b, max(sub, _round_up(pl.cdiv(B, 4), sub)))
    BB = max(sub, min(block_b, _round_up(B, sub)))
    BB = (BB // sub) * sub
    B_pad = _round_up(B, BB)

    # ---- in-kernel chunk (bounds live vregs) -----------------------------
    rows_target = 512                                   # ~512 rows of (rows, S)
    cb = max(sub, min(BB, ((rows_target // max(1, T)) // sub) * sub))
    while BB % cb != 0:                                 # cb must divide BB
        cb -= sub

    # ---- VMEM budget (lane-padded, includes intermediates) ---------------
    h_block_vmem = BB * T_pad * D_pad * itemsize
    out_block_vmem = BB * D_pad * itemsize
    w_vmem = (_round_up(D, sub) + 2 * sub) * _round_up(S, 128) * 4
    chunk_rows = cb * T_pad
    scratch_vmem = (3 * chunk_rows * _round_up(S, 128) * 4        # s / exp / alpha
                    + 2 * cb * T_pad * D_pad * 4)                 # fp32 temporaries
    vmem_est = 2 * (h_block_vmem + out_block_vmem + w_vmem) + scratch_vmem + (1 << 20)
    if vmem_est > (56 << 20):
        # TODO(synk): for very long sequences, tile T with a second "arbitrary"
        # grid axis and an online-softmax scratch accumulator instead of failing.
        raise ValueError(
            f"SelfAttention Pallas kernel would need ~{vmem_est >> 20} MiB VMEM "
            f"(T={T}, D={D}, BB={BB}); tile the time axis or lower block_b.")
    vmem_limit = int(min(64 << 20, max(32 << 20, vmem_est + (8 << 20))))

    if B_pad != B:
        # Zero-padded rows give uniform alpha over zero h -> zero output; sliced off.
        h = jnp.pad(h, ((0, B_pad - B), (0, 0), (0, 0)))

    w2_row = w2.reshape(1, S)   # (S, 1) column -> (1, S) row for the lane reduce

    out = pl.pallas_call(
        functools.partial(_self_attention_kernel, cb),
        out_shape=jax.ShapeDtypeStruct((B_pad, D), h.dtype),
        grid_spec=pltpu.PrefetchScalarGridSpec(
            num_scalar_prefetch=0,
            grid=(B_pad // BB,),
            in_specs=[
                pl.BlockSpec((BB, T, D), lambda i: (i, 0, 0)),   # streamed h
                pl.BlockSpec((D, S), lambda i: (0, 0)),          # resident weights
                pl.BlockSpec((1, S), lambda i: (0, 0)),
                pl.BlockSpec((1, S), lambda i: (0, 0)),
            ],
            out_specs=pl.BlockSpec((BB, D), lambda i: (i, 0)),
        ),
        compiler_params=pltpu.CompilerParams(
            dimension_semantics=("parallel",),   # lets v7x split batch over 2 TCs
            vmem_limit_bytes=vmem_limit,
        ),
        interpret=interpret,
    )(h, w1, b1, w2_row)
    return out[:B]


def self_attention_ref(h, w1, b1, w2, b2):
    s = jnp.tanh(jnp.einsum("btd,ds->bts", h, w1) + b1)       # (B, T, S)
    logits = jnp.einsum("bts,so->bto", s, w2) + b2            # (B, T, 1)
    alpha = jax.nn.softmax(logits, axis=1)                    # softmax over time
    return jnp.sum(alpha * h, axis=1)                         # (B, D)


if __name__ == "__main__":
    B, T, D_in, S = 2, 8, 32, 16

    key = jax.random.PRNGKey(0)
    k_h, k_w1, k_b1, k_w2, k_b2 = jax.random.split(key, 5)

    h = jax.random.normal(k_h, (B, T, D_in), dtype=jnp.float32)

    # Deterministic parameter init (Linear(size_in, size) and Linear(size, 1)).
    w1 = jax.random.normal(k_w1, (D_in, S), dtype=jnp.float32) * 0.1
    b1 = jax.random.normal(k_b1, (1, S), dtype=jnp.float32) * 0.1
    w2 = jax.random.normal(k_w2, (S, 1), dtype=jnp.float32) * 0.1
    b2 = jax.random.normal(k_b2, (1, 1), dtype=jnp.float32) * 0.1

    out = self_attention(h, w1, b1, w2, b2)
    out = jax.block_until_ready(out)

    ref = self_attention_ref(h, w1, b1, w2, b2)
    assert out.shape == (B, D_in)
    assert jnp.allclose(out, ref, atol=1e-4, rtol=1e-4), float(
        jnp.max(jnp.abs(out - ref))
    )

    print("KERNEL_OK")
</pallas_src>

<mosaic_0001>
module attributes {stable_mosaic.version = 11 : i64} {
  func.func @_self_attention_kernel(%arg0: i32, %arg1: memref<8x8x32xf32, #tpu.memory_space<vmem>>, %arg2: memref<32x16xf32, #tpu.memory_space<vmem>>, %arg3: memref<1x16xf32, #tpu.memory_space<vmem>>, %arg4: memref<1x16xf32, #tpu.memory_space<vmem>>, %arg5: memref<8x32xf32, #tpu.memory_space<vmem>>) attributes {dimension_semantics = [#tpu.dimension_semantics<parallel>], iteration_bounds = array<i64: 1>, scalar_prefetch = 0 : i64, scratch_operands = 0 : i64, tpu.core_type = #tpu.core_type<tc>, window_params = [{transform_indices = @transform_0, window_bounds = array<i64: 8, 8, 32>}, {pipeline_mode = #tpu.pipeline_mode<synchronous>, transform_indices = @transform_1, window_bounds = array<i64: 32, 16>}, {pipeline_mode = #tpu.pipeline_mode<synchronous>, transform_indices = @transform_2, window_bounds = array<i64: 1, 16>}, {pipeline_mode = #tpu.pipeline_mode<synchronous>, transform_indices = @transform_3, window_bounds = array<i64: 1, 16>}, {transform_indices = @transform_4, window_bounds = array<i64: 8, 32>}]} {
    %c0 = arith.constant 0 : index
    %c0_0 = arith.constant 0 : index
    %0 = vector.load %arg2[%c0, %c0_0] : memref<32x16xf32, #tpu.memory_space<vmem>>, vector<32x16xf32>
    %c0_1 = arith.constant 0 : index
    %c0_2 = arith.constant 0 : index
    %1 = vector.load %arg3[%c0_1, %c0_2] : memref<1x16xf32, #tpu.memory_space<vmem>>, vector<1x16xf32>
    %c0_3 = arith.constant 0 : index
    %c0_4 = arith.constant 0 : index
    %2 = vector.load %arg4[%c0_3, %c0_4] : memref<1x16xf32, #tpu.memory_space<vmem>>, vector<1x16xf32>
    %c0_i32 = arith.constant 0 : i32
    %c1_i32 = arith.constant 1 : i32
    %3 = arith.muli %c0_i32, %c1_i32 : i32
    %c0_i32_5 = arith.constant 0 : i32
    %4 = arith.addi %c0_i32_5, %3 : i32
    %c8_i32 = arith.constant 8 : i32
    %5 = arith.muli %4, %c8_i32 : i32
    %6 = tpu.assume_multiple %5, 8 : i32
    %7 = arith.index_cast %6 : i32 to index
    %c0_6 = arith.constant 0 : index
    %c0_7 = arith.constant 0 : index
    %8 = vector.load %arg1[%7, %c0_6, %c0_7] : memref<8x8x32xf32, #tpu.memory_space<vmem>>, vector<8x8x32xf32>
    %9 = vector.shape_cast %8 : vector<8x8x32xf32> to vector<64x32xf32>
    %cst = arith.constant dense<0.000000e+00> : vector<64x16xf32>
    %10 = tpu.matmul %9, %0, %cst {dimension_numbers = #tpu.dot_dimension_numbers<[1], [0], [0], [1], [0, 0, 1, 1], [], []>} : vector<64x32xf32>, vector<32x16xf32>, vector<64x16xf32> -> vector<64x16xf32>
    %11 = vector.broadcast %1 : vector<1x16xf32> to vector<64x16xf32>
    %12 = arith.addf %10, %11 : vector<64x16xf32>
    %13 = math.tanh %12 : vector<64x16xf32>
    %14 = vector.shape_cast %13 : vector<64x16xf32> to vector<8x8x16xf32>
    %15 = vector.shape_cast %2 : vector<1x16xf32> to vector<1x1x16xf32>
    %16 = vector.broadcast %15 : vector<1x1x16xf32> to vector<8x8x16xf32>
    %17 = arith.mulf %14, %16 : vector<8x8x16xf32>
    %cst_8 = arith.constant dense<0.000000e+00> : vector<8x8xf32>
    %18 = vector.multi_reduction <add>, %17, %cst_8 [2] : vector<8x8x16xf32> to vector<8x8xf32>
    %cst_9 = arith.constant dense<0xFF800000> : vector<8xf32>
    %19 = vector.multi_reduction <maximumf>, %18, %cst_9 [1] : vector<8x8xf32> to vector<8xf32>
    %20 = vector.shape_cast %19 : vector<8xf32> to vector<8x1xf32>
    %21 = vector.broadcast %20 : vector<8x1xf32> to vector<8x8xf32>
    %22 = arith.subf %18, %21 : vector<8x8xf32>
    %23 = math.exp %22 : vector<8x8xf32>
    %cst_10 = arith.constant dense<0.000000e+00> : vector<8xf32>
    %24 = vector.multi_reduction <add>, %23, %cst_10 [1] : vector<8x8xf32> to vector<8xf32>
    %25 = vector.shape_cast %24 : vector<8xf32> to vector<8x1xf32>
    %26 = vector.broadcast %25 : vector<8x1xf32> to vector<8x8xf32>
    %27 = arith.divf %23, %26 : vector<8x8xf32>
    %28 = vector.shape_cast %27 : vector<8x8xf32> to vector<8x8x1xf32>
    %29 = vector.broadcast %28 : vector<8x8x1xf32> to vector<8x8x32xf32>
    %30 = arith.mulf %29, %8 : vector<8x8x32xf32>
    %cst_11 = arith.constant dense<0.000000e+00> : vector<8x32xf32>
    %31 = vector.multi_reduction <add>, %30, %cst_11 [1] : vector<8x8x32xf32> to vector<8x32xf32>
    %32 = arith.index_cast %6 : i32 to index
    %c0_12 = arith.constant 0 : index
    %33 = vector.load %arg5[%32, %c0_12] : memref<8x32xf32, #tpu.memory_space<vmem>>, vector<8x32xf32>
    tpu.vector_store %arg5[%32, %c0_12], %31 {strides = array<i32>} : memref<8x32xf32, #tpu.memory_space<vmem>>, vector<8x32xf32>,
    %c1_i32_13 = arith.constant 1 : i32
    return
  }
  func.func @transform_0(%arg0: i32) -> (i32, i32, i32) {
    %c0_i32 = arith.constant 0 : i32
    %c0_i32_0 = arith.constant 0 : i32
    %c0_i32_1 = arith.constant 0 : i32
    return %arg0, %c0_i32, %c0_i32_0 : i32, i32, i32
  }
  func.func @transform_1(%arg0: i32) -> (i32, i32) {
    %c0_i32 = arith.constant 0 : i32
    %c0_i32_0 = arith.constant 0 : i32
    %c0_i32_1 = arith.constant 0 : i32
    return %c0_i32, %c0_i32_0 : i32, i32
  }
  func.func @transform_2(%arg0: i32) -> (i32, i32) {
    %c0_i32 = arith.constant 0 : i32
    %c0_i32_0 = arith.constant 0 : i32
    %c0_i32_1 = arith.constant 0 : i32
    return %c0_i32, %c0_i32_0 : i32, i32
  }
  func.func @transform_3(%arg0: i32) -> (i32, i32) {
    %c0_i32 = arith.constant 0 : i32
    %c0_i32_0 = arith.constant 0 : i32
    %c0_i32_1 = arith.constant 0 : i32
    return %c0_i32, %c0_i32_0 : i32, i32
  }
  func.func @transform_4(%arg0: i32) -> (i32, i32) {
    %c0_i32 = arith.constant 0 : i32
    %c0_i32_0 = arith.constant 0 : i32
    return %arg0, %c0_i32 : i32, i32
  }
}

</mosaic_0001>

<bundles_post_ra>
// kernel: tpu_custom_call.1
= control target key start
LH: loop header
LB: loop body
LE: loop exit
PB: predicated region body
PF: predicated region fallthrough
CT: control target
= control target key end

     0   :  { %9 = vsyncpa [#allocation3], 0  ;;  %s983_s0 = inlined_call_operand.hbm [shape: f32[8,8,32], index: 0, kind: input, shape index: {}]   ;;  %s984_s1 = inlined_call_operand.vmem [shape: f32[32,16], index: 1, kind: input, shape index: {}]   ;;  %s985_s2 = inlined_call_operand.vmem [shape: f32[1,16], index: 2, kind: input, shape index: {}]   ;;  %s986_s3 = inlined_call_operand.vmem [shape: f32[1,16], index: 3, kind: input, shape index: {}]   ;;  %s987_s4 = inlined_call_operand.hbm [shape: f32[8,32], index: 4, kind: output, shape index: {}]  }
   0x1   :  { %10 = vsyncpa [#allocation4], 0  ;;  %s15_s17 = sshll.u32 %s983_s0, 4  ;;  %s697_s18 = smov [#allocation2]   ;;  %s16_s17 = int_to_ptr.hbm [resolvable:$true] %s15_s17 }
   0x2   :  { %s17_s19 = sshll.u32 %s697_s18, 4  ;;  %s698_s20 = smov 128   ;;  %s18_s19 = int_to_ptr.vmem [resolvable:$true] %s17_s19 }
   0x3   :  { %s699_s21 = smov 8  }
   0x4   :  { %23 = dma.hbm_to_vmem [thread:$0]  %s16_s17, 1024, %s18_s19, [#allocation3], %s698_s20, %s698_s20, %s699_s21  }
   0x5   :  { %693 = dma.done.wait [#allocation3], 1024  }
   0x6   :  { %694 = vsyncadd [#allocation3], 4294966272  ;;  %v37_v0 = vld [vmem:[%s984_s1 + $0x18] sm:$0xff]  ;;  %v36_v1 = vld [vmem:[%s984_s1 + $0x10] sm:$0xff]  ;;  %vm53_vm0 = vcmask 261120   ;;  %vm138_vm1 = vcmask 130048   ;;  %v171_v55 = vlaneseq }
   0x7   :  { %90 = vmatpush.msra.mxu0 %v37_v0  ;;  %576 = vmatpush.msra.mxu2 %v37_v0  ;;  %v35_v2 = vld [vmem:[%s984_s1 + $0x8] sm:$0xff]  ;;  %v34_v3 = vld [vmem:[%s984_s1] sm:$0xff]  ;;  %v746_v6 = vld [vmem:[#allocation2 + $0x10] sm:$0xff]  ;;  %vm181_vm2 = vcmask 1041409   ;;  %vm183_vm3 = vcmask 1042434   ;;  %vm185_vm4 = vcmask 1043459  }
   0x8   :  { %575 = vmatpush.msra.mxu1 %v37_v0  ;;  %577 = vmatpush.msra.mxu3 %v37_v0  ;;  %v742_v4 = vld [vmem:[#allocation2] sm:$0xff]  ;;  %v750_v7 = vld [vmem:[#allocation2 + $0x30] sm:$0xff]  ;;  %v758_v8 = vld [vmem:[#allocation2 + $0x8] sm:$0xff]  ;;  %v788_v57 = vand.u32 127, %v171_v55  ;;  %vm187_vm5 = vcmask 1044484   ;;  %vm189_vm6 = vcmask 1045509  }
   0x9   :  { %91 = vmatpush.msra.mxu0 %v36_v1  ;;  %579 = vmatpush.msra.mxu2 %v36_v1  ;;  %v744_v5 = vld [vmem:[#allocation2 + $0x20] sm:$0xff]  ;;  %v760_v9 = vld [vmem:[#allocation2 + $0x28] sm:$0xff]  ;;  %v762_v10 = vld [vmem:[#allocation2 + $0x18] sm:$0xff]  ;;  %vm989_vm7 = vcmask 1046534   ;;  %vm988_vm8 = vcmask 1047559   ;;  %vm196_vm9 = vcmask 64512  }
   0xa   :  { %578 = vmatpush.msra.mxu1 %v36_v1  ;;  %580 = vmatpush.msra.mxu3 %v36_v1  ;;  %v766_v11 = vld [vmem:[#allocation2 + $0x38] sm:$0xff]  ;;  %v595_v12 = vld [vmem:[%s985_s2] ss:$0 sm:$0xff]  ;;  %s701_s2 = smov [#allocation5]   ;;  %s557_s8 = sshll.u32 %s987_s4, 4  ;;  %s558_s8 = int_to_ptr.hbm [resolvable:$true] %s557_s8 }
   0xb   :  { %92 = vmatpush.msra.mxu0 %v35_v2  ;;  %582 = vmatpush.msra.mxu2 %v35_v2  ;;  %v596_v17 = vld [vmem:[%s986_s3] ss:$0 sm:$0xff]  ;;  %s555_s3 = sshll.u32 %s701_s2, 4  ;;  %s556_s3 = int_to_ptr.vmem [resolvable:$true] %s555_s3 }
   0xc   :  { %581 = vmatpush.msra.mxu1 %v35_v2  ;;  %583 = vmatpush.msra.mxu3 %v35_v2 }
   0xd   :  { %93 = vmatpush.msra.mxu0 %v34_v3  ;;  %585 = vmatpush.msra.mxu2 %v34_v3 }
   0xe   :  { %584 = vmatpush.msra.mxu1 %v34_v3  ;;  %567 = vmatmul.msk.f32.vlgmr.msra.gmra.mxu0 %vm53_vm0, %v742_v4 }
   0xf   :  { %571 = vmatmul.msk.f32.vlgmr.msra.gmra.mxu2 %vm53_vm0, %v744_v5  ;;  %569 = vmatmul.msk.f32.vlgmr.msra.gmra.mxu1 %vm53_vm0, %v746_v6 }
  0x10   :  { %586 = vmatpush.msra.mxu3 %v34_v3 }
  0x11   :  { %573 = vmatmul.msk.f32.vlgmr.msra.gmra.mxu3 %vm53_vm0, %v750_v7 }
  0x16   :  { %568 = vmatmul.msk.f32.gmra.mxu0 %vm53_vm0, %v758_v8 }
  0x17   :  { %572 = vmatmul.msk.f32.gmra.mxu2 %vm53_vm0, %v760_v9  ;;  %570 = vmatmul.msk.f32.gmra.mxu1 %vm53_vm0, %v762_v10 }
  0x19   :  { %574 = vmatmul.msk.f32.gmra.mxu3 %vm53_vm0, %v766_v11 }
  0x8b   :  { %v95_v13 = vpop.f32.mrf.mxu0 }
  0x8c   :  { %v96_v14 = vadd.f32 %v595_v12, %v95_v13  ;;  %v101_v15 = vpop.f32.mrf.mxu1 }
  0x8d   :  { %v102_v16 = vadd.f32 %v595_v12, %v101_v15 }
  0x8e   :  { %597 = vtanh.f32 %v96_v14 }
  0x8f   :  { %599 = vtanh.f32 %v102_v16 }
  0x92   :  { %v107_v18 = vpop.f32.mrf.mxu2 }
  0x93   :  { %v108_v19 = vadd.f32 %v595_v12, %v107_v18  ;;  %v98_v20 = vpop.f32.mrf.mxu0 }
  0x94   :  { %v598_v21 = vpop.eup %597  ;;  %v99_v22 = vadd.f32 %v595_v12, %v98_v20  ;;  %v104_v23 = vpop.f32.mrf.mxu1 }
  0x95   :  { %v113_v24 = vpop.f32.mrf.mxu3  ;;  %v600_v25 = vpop.eup %599  ;;  %601 = vtanh.f32 %v108_v19  ;;  %v105_v26 = vadd.f32 %v595_v12, %v104_v23  ;;  %v130_v27 = vmul.f32 %v598_v21, %v596_v17 }
  0x96   :  { %603 = vtanh.f32 %v99_v22  ;;  %v114_v28 = vadd.f32 %v595_v12, %v113_v24  ;;  %v132_v29 = vmul.f32 %v600_v25, %v596_v17  ;;  %v700_v24 = vmov 0  }
  0x97   :  { %605 = vtanh.f32 %v105_v26  ;;  %v139_v30 = vsel %vm138_vm1, %v130_v27, 0.0  ;;  %594 = vset.pattern.permute.xlu2 %v700_v24  ;;  %593 = vset.pattern.permute.xlu1 %v700_v24 }
  0x98   :  { %140 = vadd.xlane.f32.xlu0 %v139_v30  ;;  %v145_v31 = vsel %vm138_vm1, %v132_v29, 0.0  ;;  %607 = vtanh.f32 %v114_v28 }
  0x99   :  { %146 = vadd.xlane.f32.xlu1 %v145_v31  ;;  %592 = vset.pattern.permute.xlu0 %v700_v24 }
  0x9a   :  { %v110_v32 = vpop.f32.mrf.mxu2 }
  0x9b   :  { %v602_v33 = vpop.eup %601  ;;  %v111_v34 = vadd.f32 %v595_v12, %v110_v32 }
  0x9c   :  { %v604_v35 = vpop.eup %603  ;;  %v134_v37 = vmul.f32 %v602_v33, %v596_v17 }
  0x9d   :  { %v116_v36 = vpop.f32.mrf.mxu3  ;;  %v606_v38 = vpop.eup %605  ;;  %609 = vtanh.f32 %v111_v34  ;;  %v131_v40 = vmul.f32 %v604_v35, %v596_v17 }
  0x9e   :  { %v117_v39 = vadd.f32 %v595_v12, %v116_v36  ;;  %v151_v41 = vsel %vm138_vm1, %v134_v37, 0.0  ;;  %v133_v42 = vmul.f32 %v606_v38, %v596_v17  ;;  %v608_v44 = vpop.eup %607 }
  0x9f   :  { %152 = vadd.xlane.f32.xlu2 %v151_v41  ;;  %v142_v43 = vsel %vm138_vm1, %v131_v40, 0.0  ;;  %v136_v47 = vmul.f32 %v608_v44, %v596_v17 }
  0xa0   :  { %611 = vtanh.f32 %v117_v39  ;;  %143 = vadd.xlane.f32.xlu0 %v142_v43  ;;  %v148_v45 = vsel %vm138_vm1, %v133_v42, 0.0 }
  0xa1   :  { %149 = vadd.xlane.f32.xlu1 %v148_v45  ;;  %v157_v52 = vsel %vm138_vm1, %v136_v47, 0.0 }
  0xa3   :  { %v610_v46 = vpop.eup %609 }
  0xa4   :  { %v135_v48 = vmul.f32 %v610_v46, %v596_v17 }
  0xa6   :  { %v612_v49 = vpop.eup %611  ;;  %v154_v50 = vsel %vm138_vm1, %v135_v48, 0.0 }
  0xa7   :  { %v137_v51 = vmul.f32 %v612_v49, %v596_v17  ;;  %155 = vadd.xlane.f32.xlu2 %v154_v50 }
  0xa8   :  { %158 = vadd.xlane.f32.xlu0 %v157_v52 }
  0xa9   :  { %v160_v53 = vsel %vm138_vm1, %v137_v51, 0.0 }
  0xaa   :  { %161 = vadd.xlane.f32.xlu1 %v160_v53 }
 0x10b   :  { %v141_v54 = vpop.xlane.xlu0 %140 }
 0x10c   :  { %v147_v56 = vpop.xlane.xlu1 %146  ;;  %v173_v60 = vperm.slane %v141_v54, %v788_v57 }
 0x10d   :  { %v175_v63 = vperm.slane %v147_v56, %v788_v57 }
 0x112   :  { %v153_v58 = vpop.xlane.xlu2 %152 }
 0x113   :  { %v144_v59 = vpop.xlane.xlu0 %143  ;;  %v177_v12 = vperm.slane %v153_v58, %v788_v57 }
 0x114   :  { %v174_v61 = vperm.slane %v144_v59, %v788_v57  ;;  %v150_v62 = vpop.xlane.xlu1 %149 }
 0x115   :  { %v176_v0 = vperm.slane %v150_v62, %v788_v57 }
 0x116   :  { %v182_v1 = vsel %vm181_vm2, %v174_v61, %v173_v60 }
 0x117   :  { %v184_v2 = vsel %vm183_vm3, %v175_v63, %v182_v1 }
 0x118   :  { %v186_v3 = vsel %vm185_vm4, %v176_v0, %v184_v2 }
 0x119   :  { %v188_v18 = vsel %vm187_vm5, %v177_v12, %v186_v3 }
 0x11a   :  { %v156_v13 = vpop.xlane.xlu2 %155 }
 0x11b   :  { %v178_v14 = vperm.slane %v156_v13, %v788_v57  ;;  %v159_v15 = vpop.xlane.xlu0 %158 }
 0x11c   :  { %v179_v16 = vperm.slane %v159_v15, %v788_v57 }
 0x11d   :  { %v162_v17 = vpop.xlane.xlu1 %161  ;;  %v190_v20 = vsel %vm189_vm6, %v178_v14, %v188_v18 }
 0x11e   :  { %v180_v19 = vperm.slane %v162_v17, %v788_v57  ;;  %v192_v21 = vsel %vm989_vm7, %v179_v16, %v190_v20 }
 0x120   :  { %v194_v22 = vsel %vm988_vm8, %v180_v19, %v192_v21 }
 0x121   :  { %v197_v23 = vsel %vm196_vm9, %v194_v22, -inf }
 0x122   :  { %198 = vmax.xlane.f32.xlu2 %v197_v23 }
 0x195   :  { %v199_v25 = vpop.xlane.xlu2 %198 }
 0x196   :  { %v203_v26 = vperm.slane %v199_v25, 2  ;;  %v202_v27 = vperm.slane %v199_v25, 1  ;;  %v201_v28 = vperm.slane %v199_v25, 0  ;;  %v204_v32 = vperm.slane %v199_v25, 3 }
 0x197   :  { %v205_v33 = vperm.slane %v199_v25, 4  ;;  %v208_v34 = vperm.slane %v199_v25, 7  ;;  %v206_v42 = vperm.slane %v199_v25, 5  ;;  %v207_v44 = vperm.slane %v199_v25, 6 }
 0x198   :  { %v219_v29 = vsub.f32 %v147_v56, %v203_v26  ;;  %v218_v30 = vsub.f32 %v144_v59, %v202_v27  ;;  %v217_v31 = vsub.f32 %v141_v54, %v201_v28  ;;  %v220_v38 = vsub.f32 %v150_v62, %v204_v32 }
 0x199   :  { %v221_v39 = vsub.f32 %v153_v58, %v205_v33  ;;  %v224_v40 = vsub.f32 %v162_v17, %v208_v34  ;;  %v222_v49 = vsub.f32 %v156_v13, %v206_v42  ;;  %v223_v50 = vsub.f32 %v159_v15, %v207_v44 }
 0x19a   :  { %v229_v35 = vmul.f32 1.442695, %v219_v29  ;;  %v227_v36 = vmul.f32 1.442695, %v218_v30  ;;  %v225_v37 = vmul.f32 1.442695, %v217_v31 }
 0x19b   :  { %v231_v41 = vmul.f32 1.442695, %v220_v38  ;;  %v233_v43 = vmul.f32 1.442695, %v221_v39  ;;  %v239_v46 = vmul.f32 1.442695, %v224_v40 }
 0x19c   :  { %613 = vpow2.f32 %v229_v35  ;;  %v235_v51 = vmul.f32 1.442695, %v222_v49  ;;  %v237_v52 = vmul.f32 1.442695, %v223_v50 }
 0x19d   :  { %615 = vpow2.f32 %v227_v36 }
 0x19e   :  { %617 = vpow2.f32 %v225_v37 }
 0x19f   :  { %619 = vpow2.f32 %v231_v41 }
 0x1a0   :  { %621 = vpow2.f32 %v233_v43 }
 0x1a1   :  { %623 = vpow2.f32 %v239_v46 }
 0x1a2   :  { %v806_v45 = vpop.eup %613  ;;  %625 = vpow2.f32 %v235_v51 }
 0x1a3   :  { %v808_v47 = vpop.eup %615  ;;  %256 = vperm.xlu2 %594, %v806_v45   ;;  %627 = vpow2.f32 %v237_v52 }
 0x1a4   :  { %v811_v48 = vpop.eup %617  ;;  %253 = vperm.xlu1 %593, %v808_v47  }
 0x1a5   :  { %250 = vperm.xlu0 %592, %v811_v48   ;;  %v815_v53 = vpop.eup %619 }
 0x1a6   :  { %v817_v54 = vpop.eup %621 }
 0x1a7   :  { %v820_v55 = vpop.eup %623 }
 0x1a8   :  { %v824_v56 = vpop.eup %625 }
 0x1a9   :  { %v826_v58 = vpop.eup %627 }
 0x1ab   :  { %259 = vperm.xlu2 %594, %v815_v53  }
 0x1ac   :  { %262 = vperm.xlu1 %593, %v817_v54  }
 0x1ad   :  { %271 = vperm.xlu0 %592, %v820_v55  }
 0x1b3   :  { %265 = vperm.xlu2 %594, %v824_v56  }
 0x1b4   :  { %268 = vperm.xlu1 %593, %v826_v58  }
 0x1fd   :  { %v257_v59 = vpop.permute.xlu2 %256 }
 0x1fe   :  { %v275_v3 = vperm.slane %v257_v59, %v788_v57 }
 0x205   :  { %v260_v62 = vpop.permute.xlu2 %259 }
 0x206   :  { %v276_v14 = vperm.slane %v260_v62, %v788_v57 }
 0x20d   :  { %v266_v15 = vpop.permute.xlu2 %265 }
 0x20e   :  { %v278_v19 = vperm.slane %v266_v15, %v788_v57 }
 0x216   :  { %v254_v60 = vpop.permute.xlu1 %253 }
 0x217   :  { %v251_v61 = vpop.permute.xlu0 %250  ;;  %v274_v63 = vperm.slane %v254_v60, %v788_v57 }
 0x218   :  { %v273_v0 = vperm.slane %v251_v61, %v788_v57 }
 0x21a   :  { %v281_v1 = vsel %vm181_vm2, %v274_v63, %v273_v0 }
 0x21b   :  { %v282_v12 = vsel %vm183_vm3, %v275_v3, %v281_v1 }
 0x21c   :  { %v283_v16 = vsel %vm185_vm4, %v276_v14, %v282_v12 }
 0x21e   :  { %v263_v2 = vpop.permute.xlu1 %262 }
 0x21f   :  { %v277_v13 = vperm.slane %v263_v2, %v788_v57  ;;  %v272_v18 = vpop.permute.xlu0 %271 }
 0x220   :  { %v280_v22 = vperm.slane %v272_v18, %v788_v57 }
 0x221   :  { %v284_v17 = vsel %vm187_vm5, %v277_v13, %v283_v16 }
 0x222   :  { %v285_v23 = vsel %vm189_vm6, %v278_v19, %v284_v17 }
 0x226   :  { %v269_v20 = vpop.permute.xlu1 %268 }
 0x227   :  { %v279_v21 = vperm.slane %v269_v20, %v788_v57 }
 0x229   :  { %v286_v24 = vsel %vm989_vm7, %v279_v21, %v285_v23 }
 0x22a   :  { %v287_v25 = vsel %vm988_vm8, %v280_v22, %v286_v24 }
 0x22b   :  { %v289_v26 = vsel %vm196_vm9, %v287_v25, 0.0 }
 0x22c   :  { %290 = vadd.xlane.f32.xlu2 %v289_v26 }
 0x29f   :  { %v291_v27 = vpop.xlane.xlu2 %290 }
 0x2a0   :  { %v293_v28 = vperm.slane %v291_v27, 0  ;;  %v294_v29 = vperm.slane %v291_v27, 1  ;;  %v846_v30 = vperm.slane %v291_v27, 2  ;;  %v848_v31 = vperm.slane %v291_v27, 3 }
 0x2a1   :  { %v850_v32 = vperm.slane %v291_v27, 4  ;;  %v852_v57 = vperm.slane %v291_v27, 5  ;;  %v858_v37 = vperm.slane %v291_v27, 7  ;;  %v860_v40 = vperm.slane %v291_v27, 6 }
 0x2a2   :  { %629 = vrcp.f32 %v293_v28  ;;  %v333_v33 = vand.u32 2147483647, %v294_v29  ;;  %v335_v34 = vand.u32 2147483648, %v294_v29  ;;  %v318_v35 = vand.u32 2147483647, %v293_v28 }
 0x2a3   :  { %631 = vrcp.f32 %v294_v29  ;;  %v320_v38 = vand.u32 2147483648, %v293_v28  ;;  %vm329_vm10 = vweird.f32 %v294_v29  ;;  %vm314_vm12 = vweird.f32 %v293_v28 }
 0x2a4   :  { %633 = vrcp.f32 %v846_v30  ;;  %vm864_vm11 = vcmp.eq.f32.partialorder %v333_v33, 8.507059e+37  ;;  %v336_v49 = vor.u32 1.1754944e-38, %v335_v34  ;;  %vm870_vm13 = vcmp.eq.f32.partialorder %v318_v35, 8.507059e+37 }
 0x2a5   :  { %635 = vrcp.f32 %v848_v31  ;;  %v321_v61 = vor.u32 1.1754944e-38, %v320_v38  ;;  %v365_v15 = vand.u32 2147483648, %v848_v31  ;;  %v350_v17 = vand.u32 2147483648, %v846_v30 }
 0x2a6   :  { %637 = vrcp.f32 %v850_v32  ;;  %v348_v33 = vand.u32 2147483647, %v846_v30  ;;  %v363_v35 = vand.u32 2147483647, %v848_v31  ;;  %v395_v44 = vand.u32 2147483648, %v852_v57 }
 0x2a7   :  { %639 = vrcp.f32 %v852_v57  ;;  %v380_v51 = vand.u32 2147483648, %v850_v32 }
 0x2a8   :  { %v630_v36 = vpop.eup %629  ;;  %641 = vrcp.f32 %v858_v37 }
 0x2a9   :  { %v632_v39 = vpop.eup %631  ;;  %v310_v41 = vmul.f32 %v630_v36, %v293_v28  ;;  %vm315_vm14 = vweird.f32 %v630_v36  ;;  %643 = vrcp.f32 %v860_v40 }
 0x2aa   :  { %v862_v42 = vpop.eup %633  ;;  %v325_v43 = vmul.f32 %v632_v39, %v294_v29  ;;  %vm330_vm15 = vweird.f32 %v632_v39  ;;  %vm316_vm1 = vmor %vm314_vm12, %vm315_vm14  ;;  %vm359_vm12 = vweird.f32 %v848_v31  ;;  %vm364_vm14 = vcmp.eq.f32.partialorder %v363_v35, 8.507059e+37 }
 0x2ab   :  { %v868_v46 = vpop.eup %635  ;;  %v311_v50 = vsub.f32 1.0, %v310_v41  ;;  %v340_v52 = vmul.f32 %v862_v42, %v846_v30  ;;  %vm345_vm9 = vweird.f32 %v862_v42  ;;  %vm331_vm8 = vmor %vm329_vm10, %vm330_vm15  ;;  %vm344_vm10 = vweird.f32 %v846_v30 }
 0x2ac   :  { %v876_v59 = vpop.eup %637  ;;  %v326_v60 = vsub.f32 1.0, %v325_v43  ;;  %v355_v62 = vmul.f32 %v868_v46, %v848_v31  ;;  %vm360_vm7 = vweird.f32 %v868_v46  ;;  %v351_v30 = vor.u32 1.1754944e-38, %v350_v17 }
 0x2ad   :  { %v881_v63 = vpop.eup %639  ;;  %v312_v0 = vmul.f32 %v630_v36, %v311_v50  ;;  %v341_v1 = vsub.f32 1.0, %v340_v52  ;;  %v370_v2 = vmul.f32 %v876_v59, %v850_v32  ;;  %v366_v41 = vor.u32 1.1754944e-38, %v365_v15 }
 0x2ae   :  { %v327_v3 = vmul.f32 %v632_v39, %v326_v60  ;;  %v356_v12 = vsub.f32 1.0, %v355_v62  ;;  %v385_v13 = vmul.f32 %v881_v63, %v852_v57  ;;  %v897_v23 = vpop.eup %641  ;;  %vm390_vm15 = vweird.f32 %v881_v63 }
 0x2af   :  { %v313_v14 = vadd.f32 %v630_v36, %v312_v0  ;;  %v342_v16 = vmul.f32 %v862_v42, %v341_v1  ;;  %v371_v22 = vsub.f32 1.0, %v370_v2  ;;  %v916_v38 = vpop.eup %643  ;;  %v415_v31 = vmul.f32 %v897_v23, %v858_v37 }
 0x2b0   :  { %v328_v18 = vadd.f32 %v632_v39, %v327_v3  ;;  %v357_v19 = vmul.f32 %v868_v46, %v356_v12  ;;  %v386_v27 = vsub.f32 1.0, %v385_v13  ;;  %v393_v1 = vand.u32 2147483647, %v852_v57 }
 0x2b1   :  { %v317_v20 = vsel %vm316_vm1, %v630_v36, %v313_v14  ;;  %v343_v21 = vadd.f32 %v862_v42, %v342_v16  ;;  %v416_v52 = vsub.f32 1.0, %v415_v31  ;;  %vm374_vm1 = vweird.f32 %v850_v32 }
 0x2b2   :  { %v332_v24 = vsel %vm331_vm8, %v632_v39, %v328_v18  ;;  %v322_v25 = vsel %vm870_vm13, %v321_v61, %v317_v20  ;;  %v358_v26 = vadd.f32 %v868_v46, %v357_v19  ;;  %vm346_vm8 = vmor %vm344_vm10, %vm345_vm9  ;;  %v387_v39 = vmul.f32 %v881_v63, %v386_v27 }
 0x2b3   :  { %v337_v28 = vsel %vm864_vm11, %v336_v49, %v332_v24  ;;  %v323_v29 = vmul.f32 %v811_v48, %v322_v25  ;;  %vm361_vm13 = vmor %vm359_vm12, %vm360_vm7  ;;  %v347_v36 = vsel %vm346_vm8, %v862_v42, %v343_v21  ;;  %v372_v48 = vmul.f32 %v876_v59, %v371_v22 }
 0x2b4   :  { %v338_v34 = vmul.f32 %v808_v47, %v337_v28  ;;  %v362_v47 = vsel %vm361_vm13, %v868_v46, %v358_v26  ;;  %vm349_vm11 = vcmp.eq.f32.partialorder %v348_v33, 8.507059e+37  ;;  %vm375_vm7 = vweird.f32 %v876_v59 }
 0x2b5   :  { %431 = vperm.xlu1 %593, %v323_v29   ;;  %v352_v43 = vsel %vm349_vm11, %v351_v30, %v347_v36  ;;  %v367_v42 = vsel %vm364_vm14, %v366_v41, %v362_v47  ;;  %v373_v49 = vadd.f32 %v876_v59, %v372_v48  ;;  %v400_v46 = vmul.f32 %v916_v38, %v860_v40  ;;  %vm376_vm10 = vmor %vm374_vm1, %vm375_vm7 }
 0x2b6   :  { %436 = vperm.xlu0 %592, %v338_v34   ;;  %v388_v50 = vadd.f32 %v881_v63, %v387_v39  ;;  %v353_v60 = vmul.f32 %v806_v45, %v352_v43  ;;  %v378_v61 = vand.u32 2147483647, %v850_v32  ;;  %v368_v0 = vmul.f32 %v815_v53, %v367_v42 }
 0x2b7   :  { %v401_v62 = vsub.f32 1.0, %v400_v46  ;;  %vm389_vm9 = vweird.f32 %v852_v57  ;;  %v377_v2 = vsel %vm376_vm10, %v876_v59, %v373_v49  ;;  %v381_v12 = vor.u32 1.1754944e-38, %v380_v51 }
 0x2b8   :  { %vm391_vm12 = vmor %vm389_vm9, %vm390_vm15  ;;  %v417_v32 = vmul.f32 %v897_v23, %v416_v52  ;;  %v396_v13 = vor.u32 1.1754944e-38, %v395_v44  ;;  %vm379_vm8 = vcmp.eq.f32.partialorder %v378_v61, 8.507059e+37  ;;  %vm394_vm13 = vcmp.eq.f32.partialorder %v393_v1, 8.507059e+37 }
 0x2b9   :  { %v402_v3 = vmul.f32 %v916_v38, %v401_v62  ;;  %v392_v45 = vsel %vm391_vm12, %v881_v63, %v388_v50  ;;  %v382_v53 = vsel %vm379_vm8, %v381_v12, %v377_v2  ;;  %vm405_vm11 = vweird.f32 %v916_v38 }
 0x2ba   :  { %v397_v14 = vsel %vm394_vm13, %v396_v13, %v392_v45  ;;  %v418_v15 = vadd.f32 %v897_v23, %v417_v32  ;;  %vm420_vm14 = vweird.f32 %v897_v23  ;;  %v410_v59 = vand.u32 2147483648, %v860_v40 }
 0x2bb   :  { %v403_v57 = vadd.f32 %v916_v38, %v402_v3  ;;  %v383_v63 = vmul.f32 %v817_v54, %v382_v53  ;;  %v425_v16 = vand.u32 2147483648, %v858_v37  ;;  %vm404_vm7 = vweird.f32 %v860_v40 }
 0x2bc   :  { %v408_v17 = vand.u32 2147483647, %v860_v40  ;;  %v398_v18 = vmul.f32 %v824_v56, %v397_v14  ;;  %vm419_vm15 = vweird.f32 %v858_v37  ;;  %v423_v19 = vand.u32 2147483647, %v858_v37  ;;  %vm406_vm1 = vmor %vm404_vm7, %vm405_vm11 }
 0x2bd   :  { %441 = vperm.xlu1 %593, %v353_v60   ;;  %vm421_vm9 = vmor %vm419_vm15, %vm420_vm14  ;;  %v407_v20 = vsel %vm406_vm1, %v916_v38, %v403_v57  ;;  %v411_v21 = vor.u32 1.1754944e-38, %v410_v59  ;;  %v426_v22 = vor.u32 1.1754944e-38, %v425_v16 }
 0x2be   :  { %446 = vperm.xlu0 %592, %v368_v0   ;;  %v422_v54 = vsel %vm421_vm9, %v897_v23, %v418_v15  ;;  %vm409_vm10 = vcmp.eq.f32.partialorder %v408_v17, 8.507059e+37  ;;  %vm424_vm12 = vcmp.eq.f32.partialorder %v423_v19, 8.507059e+37 }
 0x2bf   :  { %v412_v24 = vsel %vm409_vm10, %v411_v21, %v407_v20  ;;  %v427_v40 = vsel %vm424_vm12, %v426_v22, %v422_v54 }
 0x2c0   :  { %v413_v56 = vmul.f32 %v826_v58, %v412_v24  ;;  %v428_v25 = vmul.f32 %v820_v55, %v427_v40 }
 0x2c5   :  { %451 = vperm.xlu1 %593, %v383_v63  }
 0x2c6   :  { %456 = vperm.xlu0 %592, %v398_v18  }
 0x2cd   :  { %461 = vperm.xlu1 %593, %v413_v56  }
 0x2ce   :  { %466 = vperm.xlu0 %592, %v428_v25  }
 0x327   :  { %v432_v37 = vpop.permute.xlu1 %431 }
 0x328   :  { %v437_v26 = vpop.permute.xlu0 %436  ;;  %v469_v27 = vmul.f32 %v432_v37, %v742_v4 }
 0x329   :  { %v470_v28 = vmul.f32 %v437_v26, %v758_v8 }
 0x32a   :  { %v477_v23 = vsel %vm53_vm0, %v469_v27, 0.0 }
 0x32b   :  { %v484_v29 = vsel %vm53_vm0, %v470_v28, 0.0  ;;  %v478_v33 = vrot.slane %v477_v23, 4 }
 0x32c   :  { %v485_v34 = vrot.slane %v484_v29, 4 }
 0x32d   :  { %v479_v48 = vadd.f32 %v478_v33, %v477_v23 }
 0x32e   :  { %v486_v38 = vadd.f32 %v485_v34, %v484_v29 }
 0x32f   :  { %v442_v35 = vpop.permute.xlu1 %441  ;;  %v480_v39 = vrot.slane %v479_v48, 2 }
 0x330   :  { %v447_v36 = vpop.permute.xlu0 %446  ;;  %v471_v58 = vmul.f32 %v442_v35, %v746_v6  ;;  %v487_v41 = vrot.slane %v486_v38, 2 }
 0x331   :  { %v472_v55 = vmul.f32 %v447_v36, %v762_v10  ;;  %v481_v6 = vadd.f32 %v480_v39, %v479_v48 }
 0x332   :  { %v491_v47 = vsel %vm53_vm0, %v471_v58, 0.0  ;;  %v488_v10 = vadd.f32 %v487_v41, %v486_v38 }
 0x333   :  { %v498_v4 = vsel %vm53_vm0, %v472_v55, 0.0  ;;  %v492_v30 = vrot.slane %v491_v47, 4  ;;  %v482_v1 = vrot.slane %v481_v6, 1 }
 0x334   :  { %v499_v8 = vrot.slane %v498_v4, 4  ;;  %v489_v3 = vrot.slane %v488_v10, 1 }
 0x335   :  { %v493_v31 = vadd.f32 %v492_v30, %v491_v47  ;;  %v483_v57 = vadd.f32 %v482_v1, %v481_v6 }
 0x336   :  { %v500_v43 = vadd.f32 %v499_v8, %v498_v4  ;;  %v490_v63 = vadd.f32 %v489_v3, %v488_v10 }
 0x337   :  { %v494_v44 = vrot.slane %v493_v31, 2  ;;  %v452_v42 = vpop.permute.xlu1 %451 }
 0x338   :  { %v457_v49 = vpop.permute.xlu0 %456  ;;  %v473_v46 = vmul.f32 %v452_v42, %v744_v5  ;;  %v501_v51 = vrot.slane %v500_v43, 2  ;;  %v541_v40 = vsel %vm181_vm2, %v490_v63, %v483_v57  ;;  %vm994_vm2 = vcmask 1046534  }
 0x339   :  { %v474_v50 = vmul.f32 %v457_v49, %v760_v9  ;;  %v495_v60 = vadd.f32 %v494_v44, %v493_v31 }
 0x33a   :  { %v505_v52 = vsel %vm53_vm0, %v473_v46, 0.0  ;;  %v502_v45 = vadd.f32 %v501_v51, %v500_v43 }
 0x33b   :  { %v512_v61 = vsel %vm53_vm0, %v474_v50, 0.0  ;;  %v506_v62 = vrot.slane %v505_v52, 4  ;;  %v496_v32 = vrot.slane %v495_v60, 1 }
 0x33c   :  { %v513_v0 = vrot.slane %v512_v61, 4  ;;  %v503_v16 = vrot.slane %v502_v45, 1 }
 0x33d   :  { %v507_v2 = vadd.f32 %v506_v62, %v505_v52  ;;  %v497_v19 = vadd.f32 %v496_v32, %v495_v60 }
 0x33e   :  { %v514_v12 = vadd.f32 %v513_v0, %v512_v61  ;;  %v504_v56 = vadd.f32 %v503_v16, %v502_v45 }
 0x33f   :  { %v508_v13 = vrot.slane %v507_v2, 2  ;;  %v462_v5 = vpop.permute.xlu1 %461  ;;  %v542_v37 = vsel %vm183_vm3, %v497_v19, %v541_v40  ;;  %vm995_vm3 = vcmask 1047559  }
 0x340   :  { %v515_v53 = vrot.slane %v514_v12, 2  ;;  %v467_v14 = vpop.permute.xlu0 %466  ;;  %v475_v9 = vmul.f32 %v462_v5, %v750_v7  ;;  %v543_v29 = vsel %vm185_vm4, %v504_v56, %v542_v37 }
 0x341   :  { %v509_v15 = vadd.f32 %v508_v13, %v507_v2  ;;  %v476_v59 = vmul.f32 %v467_v14, %v766_v11 }
 0x342   :  { %v516_v17 = vadd.f32 %v515_v53, %v514_v12  ;;  %v519_v18 = vsel %vm53_vm0, %v475_v9, 0.0 }
 0x343   :  { %v510_v20 = vrot.slane %v509_v15, 1  ;;  %v526_v54 = vsel %vm53_vm0, %v476_v59, 0.0  ;;  %v520_v21 = vrot.slane %v519_v18, 4 }
 0x344   :  { %v527_v22 = vrot.slane %v526_v54, 4  ;;  %v517_v7 = vrot.slane %v516_v17, 1 }
 0x345   :  { %v521_v24 = vadd.f32 %v520_v21, %v519_v18  ;;  %v511_v11 = vadd.f32 %v510_v20, %v509_v15 }
 0x346   :  { %v528_v25 = vadd.f32 %v527_v22, %v526_v54  ;;  %v518_v23 = vadd.f32 %v517_v7, %v516_v17 }
 0x347   :  { %v522_v26 = vrot.slane %v521_v24, 2  ;;  %v544_v34 = vsel %vm187_vm5, %v511_v11, %v543_v29 }
 0x348   :  { %v529_v27 = vrot.slane %v528_v25, 2  ;;  %v545_v55 = vsel %vm189_vm6, %v518_v23, %v544_v34 }
 0x349   :  { %v523_v28 = vadd.f32 %v522_v26, %v521_v24 }
 0x34a   :  { %v530_v33 = vadd.f32 %v529_v27, %v528_v25 }
 0x34b   :  { %v524_v35 = vrot.slane %v523_v28, 1 }
 0x34c   :  { %v531_v36 = vrot.slane %v530_v33, 1 }
 0x34d   :  { %v525_v58 = vadd.f32 %v524_v35, %v523_v28 }
 0x34e   :  { %v532_v48 = vadd.f32 %v531_v36, %v530_v33 }
 0x34f   :  { %v546_v38 = vsel %vm994_vm2, %v525_v58, %v545_v55 }
 0x350   :  { %v547_v47 = vsel %vm995_vm3, %v532_v48, %v546_v38 }
 0x351   :  { %549 = vst.msk [vmem:[#allocation5] sm:$0xff] %vm53_vm0, %v547_v47 }
 0x352   :  { %560 = dma.vmem_to_hbm [thread:$0]  %s556_s3, 128, %s558_s8, [#allocation4]  }
 0x353   :  { %695 = dma.done.wait [#allocation4], 128  }
 0x354   :  { %696 = vsyncadd [#allocation4], 4294967168 }
 0x355   :  { %565 = vsyncpa [#allocation3], 1 }
 0x356   :  { %566 = vsyncpa [#allocation4], 1 }

</bundles_post_ra>
